<compile_context>
chip_gen: v5e
topology: v5e:2x2
jax: 0.10.0
libtpu: 0.0.40
codegen_flags: <defaults>
</compile_context>

<pallas_src>
import jax
import jax.numpy as jnp
from jax.experimental import pallas as pl
from jax.experimental.pallas import tpu as pltpu


def _make_gcn_kernel(n_nodes, n_pad, inv_n):
    """Build the per-subgraph kernel (static node counts baked in)."""

    def kernel(x_ref, adj_ref, anchor_ref, w_ref, b_ref, alpha_ref,
               h_ref, pool_ref, anchor_out_ref):
        alpha = alpha_ref[0, 0]            # PReLU slope (SMEM scalar)
        w = w_ref[...]                     # [F_in, F_out_pad] bf16 (resident)
        bias = b_ref[...]                  # [1, F_out_pad] f32   (resident)

        def prelu(z):
            return jnp.where(z >= 0, z, alpha * z)

        # ---- node branch: h = act( (adj @ x) @ W + bias ) -----------------
        # GraphConv(norm='none', weight=False, bias=False) with edge weights
        # is h1[dst] = sum_e w_e * h0[src]; re-associated so the adjacency
        # multiplies the (narrower) raw features first.
        agg = jnp.dot(adj_ref[...], x_ref[...],
                      preferred_element_type=jnp.float32)         # [N_pad, F_in] f32
        h_lin = jnp.dot(agg.astype(jnp.bfloat16), w,
                        preferred_element_type=jnp.float32)       # [N_pad, F_out_pad]
        h = prelu(h_lin + bias)
        h_ref[...] = h

        # ---- AvgPooling over the (real) nodes of this subgraph ------------
        if n_pad != n_nodes:
            row = jax.lax.broadcasted_iota(jnp.int32, (n_pad, 1), 0)
            h_valid = jnp.where(row < n_nodes, h, 0.0)
        else:
            h_valid = h
        pool_ref[...] = jnp.sum(h_valid, axis=0, keepdims=True) * inv_n

        # ---- anchor branch: act( anchor @ W + bias ) -----------------------
        a_lin = jnp.dot(anchor_ref[...], w,
                        preferred_element_type=jnp.float32)       # [1, F_out_pad]
        anchor_out_ref[...] = prelu(a_lin + bias)

    return kernel


def gcn_with_global_adg(in_feat, adj_blocks, anchor_embs, weight, bias, prelu_a):
    """Forward of OneLayerGCNWithGlobalAdg.

    in_feat:     [B*N, F_in]   node features of the batched subgraphs
    adj_blocks:  [B, N, N]     per-subgraph weighted adjacency, adj[b,dst,src]=w_e
    anchor_embs: [B, F_in]
    weight:      [F_in, F_out] Linear weight (stored transposed, bias=False)
    bias:        [F_out]
    prelu_a:     scalar PReLU slope
    Returns (h [B*N,F_out], subgraph_pool_emb [B,F_out], anchor_out [B,F_out]).
    """
    B, N, _ = adj_blocks.shape
    BN, F_in = in_feat.shape
    F_out = weight.shape[1]
    assert BN == B * N

    n_pad = ((N + 7) // 8) * 8                  # sublane alignment
    f_out_pad = ((F_out + 127) // 128) * 128    # lane-dense output stores

    x = in_feat.reshape(B, N, F_in)
    if n_pad != N:
        x = jnp.pad(x, ((0, 0), (0, n_pad - N), (0, 0)))
        adj_blocks = jnp.pad(adj_blocks, ((0, 0), (0, n_pad - N), (0, n_pad - N)))

    # zero-padded weight/bias columns -> padded output columns are exactly 0
    w_pad = jnp.pad(weight, ((0, 0), (0, f_out_pad - F_out)))
    b_pad = jnp.pad(bias.reshape(1, F_out).astype(jnp.float32),
                    ((0, 0), (0, f_out_pad - F_out)))

    # bf16 MXU operands, f32 accumulation inside the kernel
    x_bf = x.astype(jnp.bfloat16)
    adj_bf = adj_blocks.astype(jnp.bfloat16)
    anchor_bf = anchor_embs.reshape(B, 1, F_in).astype(jnp.bfloat16)
    w_bf = w_pad.astype(jnp.bfloat16)
    alpha = jnp.asarray(prelu_a, jnp.float32).reshape(1, 1)

    kernel = _make_gcn_kernel(N, n_pad, 1.0 / N)

    h_p, pool_p, anchor_p = pl.pallas_call(
        kernel,
        grid=(B,),
        in_specs=[
            pl.BlockSpec((None, n_pad, F_in), lambda b: (b, 0, 0)),     # x
            pl.BlockSpec((None, n_pad, n_pad), lambda b: (b, 0, 0)),    # adj block
            pl.BlockSpec((None, 1, F_in), lambda b: (b, 0, 0)),         # anchor
            pl.BlockSpec((F_in, f_out_pad), lambda b: (0, 0)),          # weight (resident)
            pl.BlockSpec((1, f_out_pad), lambda b: (0, 0)),             # bias   (resident)
            pl.BlockSpec(memory_space=pltpu.MemorySpace.SMEM),          # PReLU slope
        ],
        out_specs=(
            pl.BlockSpec((None, n_pad, f_out_pad), lambda b: (b, 0, 0)),
            pl.BlockSpec((None, 1, f_out_pad), lambda b: (b, 0, 0)),
            pl.BlockSpec((None, 1, f_out_pad), lambda b: (b, 0, 0)),
        ),
        out_shape=(
            jax.ShapeDtypeStruct((B, n_pad, f_out_pad), jnp.float32),   # h
            jax.ShapeDtypeStruct((B, 1, f_out_pad), jnp.float32),       # pool
            jax.ShapeDtypeStruct((B, 1, f_out_pad), jnp.float32),       # anchor_out
        ),
        compiler_params=pltpu.CompilerParams(
            dimension_semantics=("parallel",),
            vmem_limit_bytes=32 * 1024 * 1024,
        ),
    )(x_bf, adj_bf, anchor_bf, w_bf, b_pad, alpha)

    h = h_p[:, :N, :F_out].reshape(B * N, F_out)
    pool_emb = pool_p[:, 0, :F_out]
    anchor_out = anchor_p[:, 0, :F_out]
    return h, pool_emb, anchor_out


def _reference(in_feat, adj_blocks, anchor_embs, weight, bias, prelu_a):
    """Plain-JAX reference mirroring the module (same bf16 MXU inputs)."""
    B, N, _ = adj_blocks.shape
    F_in = in_feat.shape[1]
    F_out = weight.shape[1]
    x = in_feat.reshape(B, N, F_in)

    def prelu(z):
        return jnp.where(z >= 0, z, prelu_a * z)

    agg = jnp.einsum('bij,bjf->bif', adj_blocks.astype(jnp.bfloat16),
                     x.astype(jnp.bfloat16), preferred_element_type=jnp.float32)
    h_lin = jnp.einsum('bif,fo->bio', agg.astype(jnp.bfloat16),
                       weight.astype(jnp.bfloat16),
                       preferred_element_type=jnp.float32)
    h = prelu(h_lin + bias.reshape(1, 1, F_out))
    pool = jnp.mean(h, axis=1)
    a_lin = jnp.dot(anchor_embs.astype(jnp.bfloat16),
                    weight.astype(jnp.bfloat16),
                    preferred_element_type=jnp.float32)
    anchor_out = prelu(a_lin + bias.reshape(1, F_out))
    return h.reshape(B * N, F_out), pool, anchor_out


def _xavier_uniform(key, fan_in, fan_out):
    # torch.nn.init.xavier_uniform_ on nn.Linear weight [out, in], stored
    # transposed here as [in, out] for row-major x @ W.
    limit = jnp.sqrt(6.0 / (fan_in + fan_out))
    return jax.random.uniform(key, (fan_in, fan_out), jnp.float32, -limit, limit)


if __name__ == "__main__":
    key = jax.random.PRNGKey(0)
    k_feat, k_anchor, k_w, k_edges, k_ew = jax.random.split(key, 5)

    B = 2          # subgraphs in the batch
    N = 8          # nodes per subgraph
    F_in = 32
    F_out = 64

    in_feat = jax.random.normal(k_feat, (B * N, F_in), jnp.float32)
    anchor_embs = jax.random.normal(k_anchor, (B, F_in), jnp.float32)

    weight = _xavier_uniform(k_w, F_in, F_out)       # Linear(in, out, bias=False)
    bias = jnp.zeros((F_out,), jnp.float32)          # nn.Parameter filled with 0
    prelu_a = 0.25                                   # nn.PReLU default slope

    # batched graph as per-subgraph weighted adjacency blocks:
    # adj_blocks[b, dst, src] = edge weight (block-diagonal structure exploited)
    E_per_graph = 24
    src = jax.random.randint(k_edges, (B, E_per_graph), 0, N)
    dst = jax.random.randint(jax.random.fold_in(k_edges, 1), (B, E_per_graph), 0, N)
    ew = jax.random.uniform(k_ew, (B, E_per_graph), jnp.float32, 0.1, 1.0)
    adj_blocks = jnp.zeros((B, N, N), jnp.float32)
    for b in range(B):
        adj_blocks = adj_blocks.at[b, dst[b], src[b]].add(ew[b])

    h, pool_emb, anchor_out = gcn_with_global_adg(
        in_feat, adj_blocks, anchor_embs, weight, bias, prelu_a)
    jax.block_until_ready((h, pool_emb, anchor_out))

    assert h.shape == (B * N, F_out)
    assert pool_emb.shape == (B, F_out)
    assert anchor_out.shape == (B, F_out)

    h_r, pool_r, anchor_r = _reference(
        in_feat, adj_blocks, anchor_embs, weight, bias, prelu_a)
    assert bool(jnp.allclose(h, h_r, rtol=2e-2, atol=2e-2))
    assert bool(jnp.allclose(pool_emb, pool_r, rtol=2e-2, atol=2e-2))
    assert bool(jnp.allclose(anchor_out, anchor_r, rtol=2e-2, atol=2e-2))

    print("KERNEL_OK")
</pallas_src>

<mosaic_0001>
module attributes {stable_mosaic.version = 11 : i64} {
  func.func @kernel(%arg0: i32, %arg1: memref<1x8x32xbf16, #tpu.memory_space<vmem>>, %arg2: memref<1x8x8xbf16, #tpu.memory_space<vmem>>, %arg3: memref<1x1x32xbf16, #tpu.memory_space<vmem>>, %arg4: memref<32x128xbf16, #tpu.memory_space<vmem>>, %arg5: memref<1x128xf32, #tpu.memory_space<vmem>>, %arg6: memref<1x1xf32, #tpu.memory_space<smem>>, %arg7: memref<1x8x128xf32, #tpu.memory_space<vmem>>, %arg8: memref<1x1x128xf32, #tpu.memory_space<vmem>>, %arg9: memref<1x1x128xf32, #tpu.memory_space<vmem>>) attributes {dimension_semantics = [#tpu.dimension_semantics<parallel>], iteration_bounds = array<i64: 2>, scalar_prefetch = 0 : i64, scratch_operands = 0 : i64, tpu.core_type = #tpu.core_type<tc>, window_params = [{transform_indices = @transform_0, window_bounds = array<i64: 1, 8, 32>}, {transform_indices = @transform_1, window_bounds = array<i64: 1, 8, 8>}, {transform_indices = @transform_2, window_bounds = array<i64: 1, 1, 32>}, {pipeline_mode = #tpu.pipeline_mode<synchronous>, transform_indices = @transform_3, window_bounds = array<i64: 32, 128>}, {pipeline_mode = #tpu.pipeline_mode<synchronous>, transform_indices = @transform_4, window_bounds = array<i64: 1, 128>}, {transform_indices = @transform_5, window_bounds = array<i64: 1, 1>}, {transform_indices = @transform_6, window_bounds = array<i64: 1, 8, 128>}, {transform_indices = @transform_7, window_bounds = array<i64: 1, 1, 128>}, {transform_indices = @transform_8, window_bounds = array<i64: 1, 1, 128>}]} {
    %c0 = arith.constant 0 : index
    %c0_0 = arith.constant 0 : index
    %0 = memref.load %arg6[%c0, %c0_0] : memref<1x1xf32, #tpu.memory_space<smem>>
    %c0_1 = arith.constant 0 : index
    %c0_2 = arith.constant 0 : index
    %1 = vector.load %arg4[%c0_1, %c0_2] : memref<32x128xbf16, #tpu.memory_space<vmem>>, vector<32x128xbf16>
    %c0_3 = arith.constant 0 : index
    %c0_4 = arith.constant 0 : index
    %2 = vector.load %arg5[%c0_3, %c0_4] : memref<1x128xf32, #tpu.memory_space<vmem>>, vector<1x128xf32>
    %c0_5 = arith.constant 0 : index
    %c0_6 = arith.constant 0 : index
    %c0_7 = arith.constant 0 : index
    %3 = vector.load %arg2[%c0_5, %c0_6, %c0_7] : memref<1x8x8xbf16, #tpu.memory_space<vmem>>, vector<1x8x8xbf16>
    %4 = vector.shape_cast %3 : vector<1x8x8xbf16> to vector<8x8xbf16>
    %c0_8 = arith.constant 0 : index
    %c0_9 = arith.constant 0 : index
    %c0_10 = arith.constant 0 : index
    %5 = vector.load %arg1[%c0_8, %c0_9, %c0_10] : memref<1x8x32xbf16, #tpu.memory_space<vmem>>, vector<1x8x32xbf16>
    %6 = vector.shape_cast %5 : vector<1x8x32xbf16> to vector<8x32xbf16>
    %cst = arith.constant dense<0.000000e+00> : vector<8x32xf32>
    %7 = tpu.matmul %4, %6, %cst {dimension_numbers = #tpu.dot_dimension_numbers<[1], [0], [0], [1], [0, 0, 1, 1], [], []>} : vector<8x8xbf16>, vector<8x32xbf16>, vector<8x32xf32> -> vector<8x32xf32>
    %8 = arith.truncf %7 : vector<8x32xf32> to vector<8x32xbf16>
    %cst_11 = arith.constant dense<0.000000e+00> : vector<8x128xf32>
    %9 = tpu.matmul %8, %1, %cst_11 {dimension_numbers = #tpu.dot_dimension_numbers<[1], [0], [0], [1], [0, 0, 1, 1], [], []>} : vector<8x32xbf16>, vector<32x128xbf16>, vector<8x128xf32> -> vector<8x128xf32>
    %10 = vector.broadcast %2 : vector<1x128xf32> to vector<8x128xf32>
    %11 = arith.addf %9, %10 : vector<8x128xf32>
    %cst_12 = arith.constant 0.000000e+00 : f32
    %12 = vector.broadcast %cst_12 : f32 to vector<8x128xf32>
    %13 = arith.cmpf oge, %11, %12 : vector<8x128xf32>
    %14 = vector.broadcast %0 : f32 to vector<8x128xf32>
    %15 = arith.mulf %14, %11 : vector<8x128xf32>
    %16 = arith.select %13, %11, %15 : vector<8x128xi1>, vector<8x128xf32>
    %c0_13 = arith.constant 0 : index
    %c0_14 = arith.constant 0 : index
    %c0_15 = arith.constant 0 : index
    %17 = vector.load %arg7[%c0_13, %c0_14, %c0_15] : memref<1x8x128xf32, #tpu.memory_space<vmem>>, vector<1x8x128xf32>
    %18 = vector.shape_cast %17 : vector<1x8x128xf32> to vector<8x128xf32>
    %19 = vector.shape_cast %16 : vector<8x128xf32> to vector<1x8x128xf32>
    tpu.vector_store %arg7[%c0_13, %c0_14, %c0_15], %19 {strides = array<i32>} : memref<1x8x128xf32, #tpu.memory_space<vmem>>, vector<1x8x128xf32>,
    %cst_16 = arith.constant dense<0.000000e+00> : vector<128xf32>
    %20 = vector.multi_reduction <add>, %16, %cst_16 [0] : vector<8x128xf32> to vector<128xf32>
    %21 = vector.shape_cast %20 : vector<128xf32> to vector<1x128xf32>
    %cst_17 = arith.constant 1.250000e-01 : f32
    %22 = vector.broadcast %cst_17 : f32 to vector<1x128xf32>
    %23 = arith.mulf %21, %22 : vector<1x128xf32>
    %c0_18 = arith.constant 0 : index
    %c0_19 = arith.constant 0 : index
    %c0_20 = arith.constant 0 : index
    %24 = vector.load %arg8[%c0_18, %c0_19, %c0_20] : memref<1x1x128xf32, #tpu.memory_space<vmem>>, vector<1x1x128xf32>
    %25 = vector.shape_cast %24 : vector<1x1x128xf32> to vector<1x128xf32>
    %26 = vector.shape_cast %23 : vector<1x128xf32> to vector<1x1x128xf32>
    tpu.vector_store %arg8[%c0_18, %c0_19, %c0_20], %26 {strides = array<i32>} : memref<1x1x128xf32, #tpu.memory_space<vmem>>, vector<1x1x128xf32>,
    %c0_21 = arith.constant 0 : index
    %c0_22 = arith.constant 0 : index
    %c0_23 = arith.constant 0 : index
    %27 = vector.load %arg3[%c0_21, %c0_22, %c0_23] : memref<1x1x32xbf16, #tpu.memory_space<vmem>>, vector<1x1x32xbf16>
    %28 = vector.shape_cast %27 : vector<1x1x32xbf16> to vector<1x32xbf16>
    %cst_24 = arith.constant dense<0.000000e+00> : vector<1x128xf32>
    %29 = tpu.matmul %28, %1, %cst_24 {dimension_numbers = #tpu.dot_dimension_numbers<[1], [0], [0], [1], [0, 0, 1, 1], [], []>} : vector<1x32xbf16>, vector<32x128xbf16>, vector<1x128xf32> -> vector<1x128xf32>
    %30 = arith.addf %29, %2 : vector<1x128xf32>
    %cst_25 = arith.constant 0.000000e+00 : f32
    %31 = vector.broadcast %cst_25 : f32 to vector<1x128xf32>
    %32 = arith.cmpf oge, %30, %31 : vector<1x128xf32>
    %33 = vector.broadcast %0 : f32 to vector<1x128xf32>
    %34 = arith.mulf %33, %30 : vector<1x128xf32>
    %35 = arith.select %32, %30, %34 : vector<1x128xi1>, vector<1x128xf32>
    %c0_26 = arith.constant 0 : index
    %c0_27 = arith.constant 0 : index
    %c0_28 = arith.constant 0 : index
    %36 = vector.load %arg9[%c0_26, %c0_27, %c0_28] : memref<1x1x128xf32, #tpu.memory_space<vmem>>, vector<1x1x128xf32>
    %37 = vector.shape_cast %36 : vector<1x1x128xf32> to vector<1x128xf32>
    %38 = vector.shape_cast %35 : vector<1x128xf32> to vector<1x1x128xf32>
    tpu.vector_store %arg9[%c0_26, %c0_27, %c0_28], %38 {strides = array<i32>} : memref<1x1x128xf32, #tpu.memory_space<vmem>>, vector<1x1x128xf32>,
    return
  }
  func.func @transform_0(%arg0: i32) -> (i32, i32, i32) {
    %c0_i32 = arith.constant 0 : i32
    %c0_i32_0 = arith.constant 0 : i32
    %c0_i32_1 = arith.constant 0 : i32
    return %arg0, %c0_i32, %c0_i32_0 : i32, i32, i32
  }
  func.func @transform_1(%arg0: i32) -> (i32, i32, i32) {
    %c0_i32 = arith.constant 0 : i32
    %c0_i32_0 = arith.constant 0 : i32
    %c0_i32_1 = arith.constant 0 : i32
    return %arg0, %c0_i32, %c0_i32_0 : i32, i32, i32
  }
  func.func @transform_2(%arg0: i32) -> (i32, i32, i32) {
    %c0_i32 = arith.constant 0 : i32
    %c0_i32_0 = arith.constant 0 : i32
    %c0_i32_1 = arith.constant 0 : i32
    return %arg0, %c0_i32, %c0_i32_0 : i32, i32, i32
  }
  func.func @transform_3(%arg0: i32) -> (i32, i32) {
    %c0_i32 = arith.constant 0 : i32
    %c0_i32_0 = arith.constant 0 : i32
    %c0_i32_1 = arith.constant 0 : i32
    return %c0_i32, %c0_i32_0 : i32, i32
  }
  func.func @transform_4(%arg0: i32) -> (i32, i32) {
    %c0_i32 = arith.constant 0 : i32
    %c0_i32_0 = arith.constant 0 : i32
    %c0_i32_1 = arith.constant 0 : i32
    return %c0_i32, %c0_i32_0 : i32, i32
  }
  func.func @transform_5(%arg0: i32) -> (i32, i32) {
    %c0_i32 = arith.constant 0 : i32
    %c0_i32_0 = arith.constant 0 : i32
    %c0_i32_1 = arith.constant 0 : i32
    return %c0_i32, %c0_i32_0 : i32, i32
  }
  func.func @transform_6(%arg0: i32) -> (i32, i32, i32) {
    %c0_i32 = arith.constant 0 : i32
    %c0_i32_0 = arith.constant 0 : i32
    %c0_i32_1 = arith.constant 0 : i32
    return %arg0, %c0_i32, %c0_i32_0 : i32, i32, i32
  }
  func.func @transform_7(%arg0: i32) -> (i32, i32, i32) {
    %c0_i32 = arith.constant 0 : i32
    %c0_i32_0 = arith.constant 0 : i32
    %c0_i32_1 = arith.constant 0 : i32
    return %arg0, %c0_i32, %c0_i32_0 : i32, i32, i32
  }
  func.func @transform_8(%arg0: i32) -> (i32, i32, i32) {
    %c0_i32 = arith.constant 0 : i32
    %c0_i32_0 = arith.constant 0 : i32
    %c0_i32_1 = arith.constant 0 : i32
    return %arg0, %c0_i32, %c0_i32_0 : i32, i32, i32
  }
}

</mosaic_0001>

<bundles_post_ra>
// kernel: tpu_custom_call.1
= control target key start
LH: loop header
LB: loop body
LE: loop exit
PB: predicated region body
PF: predicated region fallthrough
CT: control target
= control target key end

     0   :  { %s1333_s0 = inlined_call_operand.hbm [shape: bf16[2,8,32], index: 0, kind: input, shape index: {}]   ;;  %s1334_s1 = inlined_call_operand.hbm [shape: bf16[2,8,8], index: 1, kind: input, shape index: {}]   ;;  %s1335_s2 = inlined_call_operand.vmem [shape: bf16[2,1,32], index: 2, kind: input, shape index: {}]   ;;  %s1336_s3 = inlined_call_operand.hbm [shape: bf16[32,128], index: 3, kind: input, shape index: {}]   ;;  %s1337_s4 = inlined_call_operand.vmem [shape: f32[1,128], index: 4, kind: input, shape index: {}]   ;;  %s1338_s5 = inlined_call_operand.<no memory space> [shape: f32[1,1], index: 5, kind: input, shape index: {}]   ;;  %s1339_s6 = inlined_call_operand.hbm [shape: f32[2,8,128], index: 6, kind: output, shape index: {0}]   ;;  %s1340_s7 = inlined_call_operand.hbm [shape: f32[2,1,128], index: 7, kind: output, shape index: {1}]   ;;  %s1341_s8 = inlined_call_operand.hbm [shape: f32[2,1,128], index: 8, kind: output, shape index: {2}]  }
   0x1   :  { %1349 = sst [smem:[#allocation23_spill]] %s1336_s3 }
   0x2   :  { %14 = sst [smem:[#allocation2]] %s1338_s5 }
   0x3   :  { %15 = vsyncpa [#allocation4], 0 }
   0x4   :  { %17 = vsyncpa [#allocation4 + $0x1], 0 }
   0x5   :  { %18 = vsyncpa [#allocation7], 0 }
   0x6   :  { %20 = vsyncpa [#allocation7 + $0x1], 0 }
   0x7   :  { %21 = vsyncpa [#allocation5], 0 }
   0x8   :  { %23 = vsyncpa [#allocation5 + $0x1], 0 }
   0x9   :  { %24 = vsyncpa [#allocation11], 0 }
   0xa   :  { %26 = vsyncpa [#allocation11 + $0x1], 0  ;;  %s1102_s29 = smov 0   ;;  %s1104_s30 = smov 0  }
   0xb   :  { %s1106_s9 = smov 0   ;;  %s1108_s10 = smov 0  }
   0xc LB: > { %1350 = sst [smem:[#allocation18_spill]] %s1045_s9  ;;  %s1126_s13 = sadd.s32 4294967295, %s1049_s10   ;;  %s1049_s10 = sphi %s1108_s10, %s1366_s10   ;;  %s1045_s9 = sphi %s1106_s9, %s1368_s9   ;;  %s1041_s30 = sphi %s1104_s30, %s1370_s30   ;;  %s1037_s29 = sphi %s1102_s29, %s1369_s29  }
   0xd   : > { %1351 = sst [smem:[#allocation19_spill]] %s1049_s10  ;;  %p721_p0 = scmp.ge.s32.totalorder %s1049_s10, 1 }
   0xe   : > { %s1352_s3 = sld [smem:[#allocation23_spill]]  ;;  %p53_p1 = scmp.eq.s32.totalorder %s1126_s13, 0 }
   0xf   : > { %p256_p2 = scmp.lt.s32.totalorder %s1049_s10, 3  ;;  %s1051_s15 = smov [#allocation8]  }
  0x10   : > { %s269_s16 = sshll.u32 %s1051_s15, 4  ;;  %s1052_s17 = smov 64   ;;  %s270_s16 = int_to_ptr.vmem [resolvable:$true] %s269_s16 }
  0x11   : > { %p1131_p3 = pnand %p721_p0, %p256_p2  ;;  %s1053_s18 = smov 4  }
  0x12   : > { %s1342_s19 = sadd.s32 4294967294, %s1049_s10   ;;  %s1142_s20 = sadd.s32 1, %s1049_s10  }
  0x13   : > { %p764_p4 = pneg %p1131_p3  ;;  %1354 = sst [smem:[#allocation20_spill]] %s1142_s20 }
  0x14   : > { %s267_s12 = sshll.u32 %s1352_s3, 4  ;;  %s39_s21 = sadd.s32 1, %s1045_s9  ;;  %s268_s12 = int_to_ptr.hbm [resolvable:$true] %s267_s12 }
  0x15   : > { %p765_p6 = pnand %p764_p4, %p53_p1  ;;  %s36_s22 = ssub.s32 %s1049_s10, %s1142_s20 }
  0x16   : > { %p46_p7 = scmp.ne.s32.totalorder %s1045_s9, %s1041_s30  ;;  %p37_p8 = scmp.eq.s32.totalorder %s36_s22, 0 }
  0x17   : > { %767 = dma.hbm_to_vmem [thread:$0]  (!%p765_p6), %s268_s12, 256, %s270_s16, [#allocation7], %s1052_s17, %s1052_s17, %s1053_s18  }
  0x18   : > { %p47_p9 = scmp.eq.s32.totalorder %s1049_s10, 0  ;;  %p52_p10 = scmp.ne.s32.totalorder %s1041_s30, %s1037_s29 }
  0x19   : > { %p191_p11 = scmp.eq.s32.totalorder %s1126_s13, 1  ;;  %p197_p2 = scmp.eq.s32.totalorder %s1342_s19, 1 }
  0x1a   : > { %s1154_s23 = scalar_select %p37_p8, %s1045_s9, %s39_s21  }
  0x1b   : > { %p1156_p12 = por %p47_p9, %p46_p7  ;;  %p1162_p13 = por %p53_p1, %p52_p10 }
  0x1c   : > { %1355 = sst [smem:[#allocation21_spill]] %s1154_s23  ;;  %p1166_p0 = por %p191_p11, %p46_p7 }
  0x1d   : > { %p786_p4 = scmp.lt.s32.totalorder %s1049_s10, 2  ;;  %s289_s27 = sand.u32 1, %s1045_s9  }
  0x1e   : > { %p1174_p6 = por %p197_p2, %p52_p10  ;;  %s724_s5 = sshll.u32 %s289_s27, 2 }
  0x1f   : > { %s725_s11 = sshll.u32 %s1049_s10, 2  ;;  %s293_s18 = scalar_lea.vmem [#allocation3], %s724_s5 }
  0x20   : > { %s1359_s28 = scalar_select %p1174_p6, 1, 0 }
  0x21   : > { %s297_s16 = scalar_lea.hbm %s1333_s0, %s725_s11  ;;  %s301_s21 = sshll.u32 %s293_s18, 4  ;;  %s302_s21 = int_to_ptr.vmem [resolvable:$true] %s301_s21 }
  0x22   : > { %1360 = sst [smem:[#allocation22_spill]] %s1359_s28  ;;  %s299_s17 = sshll.u32 %s297_s16, 4  ;;  %s300_s17 = int_to_ptr.hbm [resolvable:$true] %s299_s17 }
  0x23   : > { %p1184_p7 = pnand %p786_p4, %p1156_p12  ;;  %s316_s23 = scalar_lea.hbm %s1334_s1, %s725_s11 }
  0x24   : > { %s308_s9 = sand.u32 1, %s1049_s10   ;;  %s290_s20 = scalar_lea.sflag [#allocation4], %s289_s27 }
  0x25   : > { %s855_s12 = sshra.s32 %s300_s17, 4  ;;  %p859_p9 = pneg %p1184_p7  ;;  %s856_s12 = int_to_ptr.hbm [resolvable:$true] %s855_s12 }
  0x26   : > { %s857_s15 = scalar_lea.hbm %s856_s12, 4  ;;  %s862_s18 = scalar_lea.hbm %s1333_s0, 8 }
  0x27   : > { %p858_p8 = scmp.ne.s32.totalorder %s856_s12, %s857_s15  ;;  %p863_p12 = scmp.lt.s32.totalorder %s856_s12, %s1333_s0 }
  0x28   : > { %p864_p2 = scmp.lt.s32.totalorder %s862_s18, %s857_s15 }
  0x29   : > { %p860_p10 = pnand %p859_p9, %p858_p8 }
  0x2a   : > { %p865_p4 = por %p864_p2, %p863_p12 }
  0x2b   : > { %p861_p11 = pneg %p860_p10 }
  0x2d   : > { %p866_p5 = pnand %p865_p4, %p861_p11 }
  0x2f   : > { %869 = shalt.err (!%p866_p5)
}
  0x30   : > { %771 = dma.hbm_to_vmem [thread:$0]  (!%p1184_p7), %s300_s17, 64, %s302_s21, %s290_s20  }
  0x31   : > { %s318_s27 = sshll.u32 %s316_s23, 4  ;;  %s312_s11 = scalar_lea.vmem [#allocation6], %s724_s5  ;;  %s319_s27 = int_to_ptr.hbm [resolvable:$true] %s318_s27 }
  0x32   : > { %s320_s10 = sshll.u32 %s312_s11, 4  ;;  %s309_s28 = scalar_lea.sflag [#allocation7], %s308_s9  ;;  %s321_s10 = int_to_ptr.vmem [resolvable:$true] %s320_s10 }
  0x33   : > { %s885_s24 = sshra.s32 %s319_s27, 4  ;;  %s892_s18 = scalar_lea.hbm %s1334_s1, 8  ;;  %s886_s24 = int_to_ptr.hbm [resolvable:$true] %s885_s24 }
  0x34   : > { %s887_s16 = scalar_lea.hbm %s886_s24, 4  ;;  %p893_p5 = scmp.lt.s32.totalorder %s886_s24, %s1334_s1 }
  0x35   : > { %p888_p8 = scmp.ne.s32.totalorder %s886_s24, %s887_s16  ;;  %p894_p11 = scmp.lt.s32.totalorder %s892_s18, %s887_s16 }
  0x37   : > { %p890_p10 = pnand %p888_p8, %p859_p9  ;;  %p895_p2 = por %p894_p11, %p893_p5 }
  0x39   : > { %p891_p12 = pneg %p890_p10 }
  0x3b   : > { %p896_p4 = pnand %p895_p2, %p891_p12 }
  0x3d   : > { %899 = shalt.err (!%p896_p4)
}
  0x3e   : > { %774 = dma.hbm_to_vmem [thread:$0]  (!%p1184_p7), %s319_s27, 64, %s321_s10, %s309_s28  }
  0x3f   : > { %335 = sbr.rel (%p1131_p3) target bundleno = 369 (0x171), region = 44  ;;  %s1219_s9 = sand.u32 (!%p1131_p3), 1, %s1041_s30  }
  0x40   : > { %s729_s23 = sshll.u32 (!%p1131_p3), %s1219_s9, 2  ;;  %s338_s5 = scalar_lea.sflag (!%p1131_p3), [#allocation4], %s1219_s9 }
  0x41   : > { %s341_s17 = scalar_lea.vmem (!%p1131_p3), [#allocation3], %s729_s23 }
  0x44   : > { %1016 = dma.done.wait (%p1162_p13), %s338_s5, 64  }
  0x45   : > { %1018 = vsyncadd (%p1162_p13), %s338_s5, 4294967232  ;;  %s347_s10 = sand.u32 1, %s1126_s13   ;;  %s351_s28 = scalar_lea.vmem [#allocation6], %s729_s23 }
  0x46   : > { %s348_s14 = scalar_lea.sflag [#allocation7], %s347_s10 }
  0x47   : > { %1020 = dma.done.wait (%p1162_p13), %s348_s14, 64  }
  0x48   : > { %1022 = vsyncadd (%p1162_p13), %s348_s14, 4294967232 }
  0x49   : > { %1024 = dma.done.wait (%p53_p1), [#allocation7], 256  }
  0x4a   : > { %1026 = vsyncadd (%p53_p1), [#allocation7], 4294967040  ;;  %vm422_vm0 = vcmask 1043456   ;;  %v417_v0 = vld [vmem:[%s341_s17] sm:$0xf]  ;;  %v749_v1 = vld [vmem:[#allocation8 + $0x8] sm:$0xff] }
  0x4b   : > { %v424_v2 = vsel %vm422_vm0, %v417_v0, 0  ;;  %v416_v3 = vld [vmem:[%s351_s28] sm:$0xf]  ;;  %vm418_vm1 = vcmask 64512   ;;  %465 = vmatpush.bf16.msra.mxu1 %v749_v1  ;;  %495 = vmatpush.bf16.msra.mxu2 %v749_v1  ;;  %p406_p3 = scmp.lt.s32.totalorder %s1126_s13, 1  ;;  %v748_v4 = vld [vmem:[#allocation8] sm:$0xff] }
  0x4c   : > { %433 = vmatpush.bf16.msra.mxu0 %v424_v2  ;;  %vm455_vm2 = vcmask 261120   ;;  %s410_s27 = sld [smem:[#allocation2]]  ;;  %v415_v10 = vld [vmem:[%s1337_s4] sm:$0x1]  ;;  %s405_s16 = scalar_lea.vmem [#allocation12], %s1219_s9 }
  0x4d   : > { %s407_s25 = scalar_select %p406_p3, %s1126_s13, 1  ;;  %v824_v16 = vld [vmem:[%s1337_s4] ss:$0 sm:$0xff] }
  0x4e   : > { %s745_s12 = sshll.u32 %s1126_s13, 3  ;;  %s732_s3 = sshll.u32 %s1219_s9, 3 }
  0x4f   : > { %733 = vmatmul.msk.bf16.vlgmr.msra.gmra.mxu0 %vm418_vm1, %v416_v3  ;;  %s408_s19 = scalar_lea.vmem %s1335_s2, %s407_s25  ;;  %466 = vmatpush.bf16.msra.mxu1 %v748_v4  ;;  %s525_s5 = scalar_lea.hbm %s1339_s6, %s745_s12 }
  0x50   : > { %496 = vmatpush.bf16.msra.mxu2 %v748_v4  ;;  %v485_v5 = vld [vmem:[%s408_s19] sm:$0x1]  ;;  %s393_s17 = scalar_lea.vmem [#allocation9], %s732_s3  ;;  %s529_s28 = sshll.u32 %s525_s5, 4  ;;  %s530_s28 = int_to_ptr.hbm [resolvable:$true] %s529_s28 }
  0x51   : > { %s527_s14 = sshll.u32 %s393_s17, 4  ;;  %s507_s25 = scalar_lea.sflag [#allocation5], %s1219_s9  ;;  %s528_s14 = int_to_ptr.vmem [resolvable:$true] %s527_s14 }
  0x52   : > { %v473_v12 = vstv %s410_s27  ;;  %s929_s21 = sshra.s32 %s530_s28, 4  ;;  %s935_s11 = scalar_lea.hbm %s1339_s6, 16  ;;  %s930_s21 = int_to_ptr.hbm [resolvable:$true] %s929_s21 }
  0x53   : > { %743 = vmatmul.msk.bf16.vlgmr.msra.gmra.mxu2 %vm455_vm2, %v485_v5  ;;  %s931_s22 = scalar_lea.hbm %s930_s21, 8  ;;  %p936_p9 = scmp.lt.s32.totalorder %s930_s21, %s1339_s6 }
  0x54   : > { %p932_p1 = scmp.ne.s32.totalorder %s930_s21, %s931_s22  ;;  %p937_p8 = scmp.lt.s32.totalorder %s935_s11, %s931_s22 }
  0x56   : > { %p933_p13 = pnand %p932_p1, %p1166_p0  ;;  %p938_p10 = por %p937_p8, %p936_p9 }
  0x58   : > { %p934_p7 = pneg %p933_p13 }
  0x5a   : > { %p939_p12 = pnand %p938_p10, %p934_p7 }
  0xcc   : > { %v435_v6 = vpop.f32.mrf.mxu0 }
  0xcd   : > { %v439_v7 = vpack.c.bf16 %v435_v6, %v435_v6 }
  0xcf   : > { %742 = vmatmul.msk.bf16.vlgmr.msra.gmra.mxu1 %vm455_vm2, %v439_v7 }
  0xd4   : > { %v437_v8 = vpop.f32.mrf.mxu0 }
  0xd6   : > { %v498_v9 = vpop.f32.mrf.mxu2 }
  0xd7   : > { %v499_v11 = vadd.f32 %v498_v9, %v415_v10 }
  0xd9   : > { %vm502_vm3 = vcmp.ge.f32.partialorder %v499_v11, 0.0  ;;  %v503_v14 = vmul.f32 %v499_v11, %v473_v12 }
  0xdb   : > { %v504_v15 = vsel %vm502_vm3, %v499_v11, %v503_v14 }
  0xdc   : > { %505 = vst [vmem:[%s405_s16] sm:$0x1] %v504_v15 }
  0xde   : > { %v500_v13 = vpop.f32.mrf.mxu2 }
 0x14c   : > { %v468_v17 = vpop.f32.mrf.mxu1 }
 0x14d   : > { %v469_v18 = vadd.f32 %v824_v16, %v468_v17 }
 0x14f   : > { %vm472_vm4 = vcmp.ge.f32.partialorder %v469_v18, 0.0  ;;  %v474_v19 = vmul.f32 %v473_v12, %v469_v18 }
 0x151   : > { %v475_v20 = vsel %vm472_vm4, %v469_v18, %v474_v19 }
 0x152   : > { %v477_v21 = vrot.slane %v475_v20, 4  ;;  %476 = vst [vmem:[%s393_s17] sm:$0xff] %v475_v20 }
 0x153   : > { %942 = shalt.err (!%p939_p12)
}
 0x154   : > { %758 = dma.vmem_to_hbm [thread:$0]  (%p1166_p0), %s528_s14, 128, %s530_s28, %s507_s25   ;;  %v478_v22 = vadd.f32 %v477_v21, %v475_v20  ;;  %v470_v23 = vpop.f32.mrf.mxu1 }
 0x155   : > { %s538_s3 = scalar_lea.hbm %s1340_s7, %s1126_s13  ;;  %s551_s5 = scalar_lea.hbm %s1341_s8, %s1126_s13 }
 0x156   : > { %v479_v24 = vrot.slane %v478_v22, 2  ;;  %s399_s17 = scalar_lea.vmem [#allocation10], %s1219_s9  ;;  %s542_s22 = sshll.u32 %s538_s3, 4  ;;  %s543_s22 = int_to_ptr.hbm [resolvable:$true] %s542_s22 }
 0x157   : > { %s540_s21 = sshll.u32 %s399_s17, 4  ;;  %s1279_s14 = sshll.u32 %s405_s16, 4  ;;  %s541_s21 = int_to_ptr.vmem [resolvable:$true] %s540_s21  ;;  %s554_s14 = int_to_ptr.vmem [resolvable:$true] %s1279_s14 }
 0x158   : > { %v480_v25 = vadd.f32 %v479_v24, %v478_v22  ;;  %s1281_s28 = sshll.u32 %s551_s5, 4  ;;  %s512_s25 = scalar_lea.sflag [#allocation11], %s347_s10  ;;  %s556_s28 = int_to_ptr.hbm [resolvable:$true] %s1281_s28 }
 0x159   : > { %s957_s19 = sshra.s32 %s543_s22, 4  ;;  %s963_s11 = scalar_lea.hbm %s1340_s7, 2  ;;  %s958_s19 = int_to_ptr.hbm [resolvable:$true] %s957_s19 }
 0x15a   : > { %v481_v26 = vrot.slane %v480_v25, 1  ;;  %s959_s27 = scalar_lea.hbm %s958_s19, 1  ;;  %p964_p4 = scmp.lt.s32.totalorder %s958_s19, %s1340_s7 }
 0x15b   : > { %p960_p5 = scmp.ne.s32.totalorder %s958_s19, %s959_s27  ;;  %p965_p3 = scmp.lt.s32.totalorder %s963_s11, %s959_s27 }
 0x15c   : > { %v482_v27 = vadd.f32 %v481_v26, %v480_v25 }
 0x15d   : > { %p961_p11 = pnand %p960_p5, %p1166_p0  ;;  %p966_p1 = por %p965_p3, %p964_p4 }
 0x15e   : > { %v483_v28 = vmul.f32 0.125, %v482_v27 }
 0x15f   : > { %p962_p2 = pneg %p961_p11 }
 0x160   : > { %484 = vst [vmem:[%s399_s17] sm:$0x1] %v483_v28 }
 0x161   : > { %p967_p13 = pnand %p966_p1, %p962_p2 }
 0x163   : > { %970 = shalt.err (!%p967_p13)
}
 0x164   : > { %759 = dma.vmem_to_hbm [thread:$0]  (%p1166_p0), %s541_s21, 16, %s543_s22, %s512_s25  }
 0x165   : > { %s985_s13 = sshra.s32 %s556_s28, 4  ;;  %s991_s3 = scalar_lea.hbm %s1341_s8, 2  ;;  %s986_s13 = int_to_ptr.hbm [resolvable:$true] %s985_s13 }
 0x166   : > { %s987_s10 = scalar_lea.hbm %s986_s13, 1  ;;  %p992_p10 = scmp.lt.s32.totalorder %s986_s13, %s1341_s8 }
 0x167   : > { %p988_p7 = scmp.ne.s32.totalorder %s986_s13, %s987_s10  ;;  %p993_p12 = scmp.lt.s32.totalorder %s991_s3, %s987_s10 }
 0x169   : > { %p989_p9 = pnand %p988_p7, %p1166_p0  ;;  %p994_p5 = por %p993_p12, %p992_p10 }
 0x16b   : > { %p990_p8 = pneg %p989_p9 }
 0x16d   : > { %p995_p11 = pnand %p994_p5, %p990_p8 }
 0x16f   : > { %998 = shalt.err (!%p995_p11)
}
 0x170   : > { %760 = dma.vmem_to_hbm [thread:$0]  (%p1166_p0), %s554_s14, 16, %s556_s28, %s512_s25  }
 0x171 PF: > { %s1363_s17 = sld [smem:[#allocation19_spill]]  ;;  %s567_s21 = sand.u32 1, %s1037_s29  }
 0x172   : > { %s568_s22 = scalar_lea.sflag [#allocation5], %s567_s21 }
 0x177   : > { %p1364_p2 = scmp.ge.s32.totalorder %s1363_s17, 2 }
 0x179   : > { %p776_p4 = pnand %p1364_p2, %p1174_p6 }
 0x17b   : > { %p777_p3 = pneg %p776_p4 }
 0x17d   : > { %1028 = dma.done.wait (%p777_p3), %s568_s22, 128  }
 0x17e   : > { %1030 = vsyncadd (%p777_p3), %s568_s22, 4294967168  ;;  %s1365_s19 = sadd.s32 4294967294, %s1363_s17  }
 0x17f   : > { %s577_s26 = sand.u32 1, %s1365_s19  }
 0x180   : > { %s578_s27 = scalar_lea.sflag [#allocation11], %s577_s26 }
 0x181   : > { %1032 = dma.done.wait (%p777_p3), %s578_s27, 32  }
 0x182   : > { %1034 = vsyncadd (%p777_p3), %s578_s27, 4294967264  ;;  %s1366_s10 = sld [smem:[#allocation20_spill]]  ;;  %s1369_s29 = smov %s1041_s30 }
 0x183   : > { %s1367_s14 = sld [smem:[#allocation18_spill]] }
 0x184   : > { %s1368_s9 = sld [smem:[#allocation21_spill]] }
 0x188   : > { %p29_p0 = scmp.ge.s32.totalorder %s1366_s10, 4  }
 0x189   : > { %s1370_s30 = smov %s1367_s14 }
 0x18a   :  { %31 = sbr.rel (!%p29_p0) target bundleno = 12 (0xc), region = 141 }
 0x18f   :  { %592 = vsyncpa [#allocation4], 1 }
 0x190   :  { %594 = vsyncpa [#allocation4 + $0x1], 1 }
 0x191   :  { %595 = vsyncpa [#allocation7], 1 }
 0x192   :  { %597 = vsyncpa [#allocation7 + $0x1], 1 }
 0x193   :  { %598 = vsyncpa [#allocation5], 1 }
 0x194   :  { %600 = vsyncpa [#allocation5 + $0x1], 1 }
 0x195   :  { %601 = vsyncpa [#allocation11], 1 }
 0x196   :  { %603 = vsyncpa [#allocation11 + $0x1], 1 }

</bundles_post_ra>
